<compile_context>
chip_gen: v6e
topology: v6e:2x2x1
jax: 0.10.0
libtpu: 0.0.40
codegen_flags: <defaults>
</compile_context>

<pallas_src>
import functools

import jax
import jax.numpy as jnp
from jax.experimental import pallas as pl
from jax.experimental.pallas import tpu as pltpu


def _round_up(x, m):
    return ((x + m - 1) // m) * m


def _cdiv(a, b):
    return (a + b - 1) // b


def _sublane_multiple(dtype):
    # vregs pack sub-32-bit dtypes along sublanes: 8 rows f32, 16 bf16, 32 int8.
    return 8 * max(1, 4 // jnp.dtype(dtype).itemsize)


# NOTE: both kernels assume the reduction axis (k) is the LAST grid axis and
# that the output / accumulator BlockSpec ignores k, so the block stays
# resident in VMEM across the whole reduction. Do not reorder the grid.

def _linear_kernel_f32out(x_ref, w_ref, b_ref, o_ref):
    """f32 output: accumulate directly into the resident output tile."""
    k = pl.program_id(2)

    @pl.when(k == 0)
    def _():
        o_ref[...] = jnp.broadcast_to(b_ref[...], o_ref.shape)

    o_ref[...] += jnp.dot(x_ref[...], w_ref[...],
                          preferred_element_type=jnp.float32)


def _linear_kernel_acc(x_ref, w_ref, b_ref, o_ref, acc_ref):
    """Narrow output dtypes: accumulate in an f32 scratch, cast at the end."""
    k = pl.program_id(2)

    @pl.when(k == 0)
    def _():
        acc_ref[...] = jnp.broadcast_to(b_ref[...], acc_ref.shape)

    acc_ref[...] += jnp.dot(x_ref[...], w_ref[...],
                            preferred_element_type=jnp.float32)

    @pl.when(k == pl.num_programs(2) - 1)
    def _():
        o_ref[...] = acc_ref[...].astype(o_ref.dtype)


def prepare_params(weight, bias, compute_dtype=jnp.bfloat16):
    """One-time parameter prep (do at init, NOT per forward call).

    weight: (out_features, in_features)  -- PyTorch nn.Linear layout
    bias:   (out_features,)
    Returns (w_kn, b2d): weight transposed to (in_features, out_features) and
    cast to compute_dtype (no per-call HBM cast/copy, no per-tile transpose),
    and the bias as a (1, out_features) f32 row.
    """
    w_kn = jnp.asarray(weight).T
    if w_kn.dtype != jnp.dtype(compute_dtype):
        w_kn = w_kn.astype(compute_dtype)
    b2d = jnp.asarray(bias).reshape(1, -1)
    if b2d.dtype != jnp.float32:
        b2d = b2d.astype(jnp.float32)
    return w_kn, b2d


@functools.partial(
    jax.jit,
    static_argnames=("out_dtype", "tm", "tn", "tk", "vmem_limit_bytes"))
def linear_prepared(x, w_kn, b2d, *, out_dtype=None, tm=512, tn=1024, tk=1024,
                    vmem_limit_bytes=48 * 1024 * 1024):
    """y = x @ w_kn + bias via a tiled Pallas TPU matmul.

    x:    (..., K) activations (cast to w_kn.dtype on the fly if needed)
    w_kn: (K, N) weight, already transposed + cast by prepare_params
    b2d:  (1, N) float32 bias
    """
    K, N = w_kn.shape
    assert x.shape[-1] == K, (x.shape, w_kn.shape)
    lead = x.shape[:-1]
    out_dtype = jnp.dtype(x.dtype if out_dtype is None else out_dtype)
    compute_dtype = w_kn.dtype

    x2d = x.reshape(-1, K)
    if x2d.dtype != compute_dtype:
        x2d = x2d.astype(compute_dtype)
    M = x2d.shape[0]

    # ---- tile selection -----------------------------------------------------
    sub = _sublane_multiple(compute_dtype)      # dtype-native sublane pack
    tm = _round_up(max(tm, sub), sub)           # sanitize user tile sizes
    tn = _round_up(max(tn, 128), 128)
    tk = _round_up(max(tk, 128), 128)

    tm_ = min(tm, _round_up(M, sub))
    tn_ = min(tn, _round_up(N, 128))

    # tk must evenly divide the (128-aligned) K extent so the reduction never
    # reads out-of-bounds K: pick the largest 128-multiple divisor <= tk.
    K128 = _round_up(K, 128)
    tk_ = min(tk, K128)
    while K128 % tk_ != 0:
        tk_ -= 128

    # v7x megacore: keep >= 2 tiles on the parallel axes when N allows it so
    # both TensorCores get work. Harmless on v5e/v6e (single TC).
    if _cdiv(M, tm_) * _cdiv(N, tn_) == 1 and tn_ >= 256:
        tn_ = _round_up(_cdiv(tn_, 2), 128)

    # ---- K zero-padding only (reduction exactness). Ragged M/N edge blocks
    # are left to Pallas masking: OOB loads only feed output rows/cols >= M/N,
    # which are never written back. Skipped entirely when K is tile-aligned.
    K_pad = _round_up(K, tk_)
    if K_pad != K:
        x2d = jnp.pad(x2d, ((0, 0), (0, K_pad - K)))
        w_kn = jnp.pad(w_kn, ((0, K_pad - K), (0, 0)))

    grid = (_cdiv(M, tm_), _cdiv(N, tn_), K_pad // tk_)

    if out_dtype == jnp.dtype(jnp.float32):
        kernel = _linear_kernel_f32out
        scratch_shapes = []
    else:
        kernel = _linear_kernel_acc
        scratch_shapes = [pltpu.VMEM((tm_, tn_), jnp.float32)]

    cost = pl.CostEstimate(
        flops=2 * M * N * K_pad,
        transcendentals=0,
        bytes_accessed=(x2d.size * x2d.dtype.itemsize
                        + w_kn.size * w_kn.dtype.itemsize
                        + b2d.size * b2d.dtype.itemsize
                        + M * N * out_dtype.itemsize),
    )

    out2d = pl.pallas_call(
        kernel,
        out_shape=jax.ShapeDtypeStruct((M, N), out_dtype),
        grid_spec=pltpu.PrefetchScalarGridSpec(
            num_scalar_prefetch=0,
            grid=grid,
            in_specs=[
                pl.BlockSpec((tm_, tk_), lambda i, j, k: (i, k)),   # x  (M, K)
                pl.BlockSpec((tk_, tn_), lambda i, j, k: (k, j)),   # W  (K, N)
                pl.BlockSpec((1, tn_), lambda i, j, k: (0, j)),     # bias
            ],
            out_specs=pl.BlockSpec((tm_, tn_), lambda i, j, k: (i, j)),
            scratch_shapes=scratch_shapes,
        ),
        compiler_params=pltpu.CompilerParams(
            dimension_semantics=("parallel", "parallel", "arbitrary"),
            vmem_limit_bytes=vmem_limit_bytes,
        ),
        cost_estimate=cost,
    )(x2d, w_kn, b2d)

    return out2d.reshape(*lead, N)


def column_parallel_linear(x, weight, bias, *, compute_dtype=jnp.bfloat16, **kw):
    """Module-equivalent forward (tp size == 1): y = x @ weight.T + bias.

    Accepts the PyTorch (out_features, in_features) weight. For repeated calls
    prefer prepare_params(...) once + linear_prepared(...) so the weight
    cast/transpose isn't redone per call.
    """
    w_kn, b2d = prepare_params(weight, bias, compute_dtype)
    return linear_prepared(x, w_kn, b2d, out_dtype=x.dtype, **kw)


if __name__ == "__main__":
    # Deterministic synthetic parameters / inputs (no checkpoint loading).
    batch, seq = 2, 8
    in_features, out_features = 32, 64

    key = jax.random.PRNGKey(0)
    kx, kw, kb = jax.random.split(key, 3)

    x = jax.random.normal(kx, (batch, seq, in_features), dtype=jnp.float32)
    # Mimic nn.Linear's uniform(-1/sqrt(in), 1/sqrt(in)) init, deterministically.
    bound = 1.0 / (in_features ** 0.5)
    weight = jax.random.uniform(
        kw, (out_features, in_features), minval=-bound, maxval=bound,
        dtype=jnp.float32)
    bias = jax.random.uniform(
        kb, (out_features,), minval=-bound, maxval=bound, dtype=jnp.float32)

    y_ref = x @ weight.T + bias

    # 1) Exact-precision path: f32 weight, f32 accumulate-into-output kernel.
    w_f32, b2d = prepare_params(weight, bias, compute_dtype=jnp.float32)
    y_f32 = jax.block_until_ready(linear_prepared(x, w_f32, b2d))
    assert y_f32.shape == (batch, seq, out_features)
    assert jnp.allclose(y_f32, y_ref, atol=1e-5, rtol=1e-5)

    # 2) Fast path: bf16 weight prepared once, f32 accumulation / f32 output.
    w_bf16, _ = prepare_params(weight, bias, compute_dtype=jnp.bfloat16)
    y_bf16 = jax.block_until_ready(linear_prepared(x, w_bf16, b2d))
    assert jnp.allclose(y_bf16, y_ref, atol=2e-2, rtol=2e-2)

    # 3) Module-style convenience call with PyTorch-layout weight.
    y_mod = jax.block_until_ready(column_parallel_linear(x, weight, bias))
    assert y_mod.shape == (batch, seq, out_features)
    assert jnp.allclose(y_mod, y_ref, atol=2e-2, rtol=2e-2)

    # 4) Ragged shapes (M=15, K=48 -> zero-pad to 128, N=72) + bf16 output:
    #    exercises cdiv grids, masked edge blocks, and the acc-scratch kernel.
    b2, s2, in2, out2 = 3, 5, 48, 72
    k2x, k2w, k2b = jax.random.split(jax.random.PRNGKey(1), 3)
    x2 = jax.random.normal(k2x, (b2, s2, in2), dtype=jnp.float32).astype(jnp.bfloat16)
    w2 = jax.random.normal(k2w, (out2, in2), dtype=jnp.float32) * 0.1
    bb2 = jax.random.normal(k2b, (out2,), dtype=jnp.float32) * 0.1
    w2_kn, bb2_2d = prepare_params(w2, bb2)
    y2 = jax.block_until_ready(linear_prepared(x2, w2_kn, bb2_2d))
    assert y2.shape == (b2, s2, out2) and y2.dtype == jnp.bfloat16
    y2_ref = x2.astype(jnp.float32) @ w2.T + bb2
    assert jnp.allclose(y2.astype(jnp.float32), y2_ref, atol=5e-2, rtol=5e-2)

    print("KERNEL_OK")
</pallas_src>

<mosaic_0001>
module attributes {stable_mosaic.version = 11 : i64} {
  func.func @_linear_kernel_f32out(%arg0: i32, %arg1: i32, %arg2: i32, %arg3: memref<16x128xf32, #tpu.memory_space<vmem>>, %arg4: memref<128x128xf32, #tpu.memory_space<vmem>>, %arg5: memref<1x128xf32, #tpu.memory_space<vmem>>, %arg6: memref<16x128xf32, #tpu.memory_space<vmem>>) attributes {dimension_semantics = [#tpu.dimension_semantics<parallel>, #tpu.dimension_semantics<parallel>, #tpu.dimension_semantics<arbitrary>], iteration_bounds = array<i64: 1, 1, 1>, scalar_prefetch = 0 : i64, scratch_operands = 0 : i64, tpu.core_type = #tpu.core_type<tc>, window_params = [{transform_indices = @transform_0, window_bounds = array<i64: 16, 128>}, {transform_indices = @transform_1, window_bounds = array<i64: 128, 128>}, {transform_indices = @transform_2, window_bounds = array<i64: 1, 128>}, {transform_indices = @transform_3, window_bounds = array<i64: 16, 128>}]} {
    %c0_i32 = arith.constant 0 : i32
    %0 = arith.cmpi eq, %arg2, %c0_i32 : i32
    %1 = arith.extui %0 : i1 to i32
    %c0_i32_0 = arith.constant 0 : i32
    %2 = arith.cmpi ne, %1, %c0_i32_0 : i32
    scf.if %2 {
      %c0_8 = arith.constant 0 : index
      %c0_9 = arith.constant 0 : index
      %9 = vector.load %arg5[%c0_8, %c0_9] : memref<1x128xf32, #tpu.memory_space<vmem>>, vector<1x128xf32>
      %10 = vector.shape_cast %9 : vector<1x128xf32> to vector<1x128xf32>
      %11 = vector.broadcast %10 : vector<1x128xf32> to vector<16x128xf32>
      %c0_10 = arith.constant 0 : index
      %c0_11 = arith.constant 0 : index
      %12 = vector.load %arg6[%c0_10, %c0_11] : memref<16x128xf32, #tpu.memory_space<vmem>>, vector<16x128xf32>
      tpu.vector_store %arg6[%c0_10, %c0_11], %11 {strides = array<i32>} : memref<16x128xf32, #tpu.memory_space<vmem>>, vector<16x128xf32>,
    } else {
    }
    %c0 = arith.constant 0 : index
    %c0_1 = arith.constant 0 : index
    %3 = vector.load %arg6[%c0, %c0_1] : memref<16x128xf32, #tpu.memory_space<vmem>>, vector<16x128xf32>
    %c0_2 = arith.constant 0 : index
    %c0_3 = arith.constant 0 : index
    %4 = vector.load %arg3[%c0_2, %c0_3] : memref<16x128xf32, #tpu.memory_space<vmem>>, vector<16x128xf32>
    %c0_4 = arith.constant 0 : index
    %c0_5 = arith.constant 0 : index
    %5 = vector.load %arg4[%c0_4, %c0_5] : memref<128x128xf32, #tpu.memory_space<vmem>>, vector<128x128xf32>
    %cst = arith.constant dense<0.000000e+00> : vector<16x128xf32>
    %6 = tpu.matmul %4, %5, %cst {dimension_numbers = #tpu.dot_dimension_numbers<[1], [0], [0], [1], [0, 0, 1, 1], [], []>} : vector<16x128xf32>, vector<128x128xf32>, vector<16x128xf32> -> vector<16x128xf32>
    %7 = arith.addf %3, %6 : vector<16x128xf32>
    %c0_6 = arith.constant 0 : index
    %c0_7 = arith.constant 0 : index
    %8 = vector.load %arg6[%c0_6, %c0_7] : memref<16x128xf32, #tpu.memory_space<vmem>>, vector<16x128xf32>
    tpu.vector_store %arg6[%c0_6, %c0_7], %7 {strides = array<i32>} : memref<16x128xf32, #tpu.memory_space<vmem>>, vector<16x128xf32>,
    return
  }
  func.func @transform_0(%arg0: i32, %arg1: i32, %arg2: i32) -> (i32, i32) {
    %c0_i32 = arith.constant 0 : i32
    return %arg0, %arg2 : i32, i32
  }
  func.func @transform_1(%arg0: i32, %arg1: i32, %arg2: i32) -> (i32, i32) {
    %c0_i32 = arith.constant 0 : i32
    return %arg2, %arg1 : i32, i32
  }
  func.func @transform_2(%arg0: i32, %arg1: i32, %arg2: i32) -> (i32, i32) {
    %c0_i32 = arith.constant 0 : i32
    %c0_i32_0 = arith.constant 0 : i32
    return %c0_i32, %arg1 : i32, i32
  }
  func.func @transform_3(%arg0: i32, %arg1: i32, %arg2: i32) -> (i32, i32) {
    %c0_i32 = arith.constant 0 : i32
    return %arg0, %arg1 : i32, i32
  }
}

</mosaic_0001>

<bundles_post_ra>
// kernel: linear_prepared.1
= control target key start
LH: loop header
LB: loop body
LE: loop exit
PB: predicated region body
PF: predicated region fallthrough
CT: control target
= control target key end

     0   :  { %s305_s0 = inlined_call_operand.vmem [shape: f32[16,128], index: 0, kind: input, shape index: {}]   ;;  %s306_s1 = inlined_call_operand.vmem [shape: f32[128,64], index: 1, kind: input, shape index: {}]   ;;  %s307_s2 = inlined_call_operand.vmem [shape: f32[1,64], index: 2, kind: input, shape index: {}]   ;;  %s308_s3 = inlined_call_operand.hbm [shape: f32[16,64], index: 3, kind: output, shape index: {}]  }
   0x1   :  { %v47_v0 = vld [vmem:[%s306_s1 + $0x78] sm:$0xff]  ;;  %v46_v1 = vld [vmem:[%s306_s1 + $0x70] sm:$0xff]  ;;  %v45_v2 = vld [vmem:[%s306_s1 + $0x68] sm:$0xff] }
   0x2   :  { %162 = vmatprep.subr.mxu0 %v47_v0  ;;  %v44_v3 = vld [vmem:[%s306_s1 + $0x60] sm:$0xff]  ;;  %v43_v5 = vld [vmem:[%s306_s1 + $0x58] sm:$0xff] }
   0x3   :  { %163 = vmatpush3.msra.mxu0 %v47_v0  ;;  %v30_v4 = vld [vmem:[%s305_s0] sm:$0xff] }
   0x4   :  { %164 = vmatprep.subr.mxu0 %v46_v1  ;;  %194 = vmatprep.mubr.f32.mxu0 %v30_v4 }
   0x5   :  { %165 = vmatpush3.msra.mxu0 %v46_v1 }
   0x6   :  { %166 = vmatprep.subr.mxu0 %v45_v2 }
   0x7   :  { %167 = vmatpush3.msra.mxu0 %v45_v2 }
   0x8   :  { %8 = vsyncpa [#allocation3], 0  ;;  %168 = vmatprep.subr.mxu0 %v44_v3  ;;  %v42_v6 = vld [vmem:[%s306_s1 + $0x50] sm:$0xff]  ;;  %v41_v7 = vld [vmem:[%s306_s1 + $0x48] sm:$0xff]  ;;  %s222_s23 = smov [#allocation2]  }
   0x9   :  { %169 = vmatpush3.msra.mxu0 %v44_v3  ;;  %v40_v8 = vld [vmem:[%s306_s1 + $0x40] sm:$0xff]  ;;  %v39_v9 = vld [vmem:[%s306_s1 + $0x38] sm:$0xff]  ;;  %v38_v10 = vld [vmem:[%s306_s1 + $0x30] sm:$0xff]  ;;  %s132_s24 = sshll.u32 %s222_s23, 4  ;;  %s133_s24 = int_to_ptr.vmem [resolvable:$true] %s132_s24 }
   0xa   :  { %170 = vmatprep.subr.mxu0 %v43_v5  ;;  %v37_v11 = vld [vmem:[%s306_s1 + $0x28] sm:$0xff]  ;;  %v36_v12 = vld [vmem:[%s306_s1 + $0x20] sm:$0xff]  ;;  %v35_v13 = vld [vmem:[%s306_s1 + $0x18] sm:$0xff]  ;;  %p205_p1 = scmp.lt.s32.totalorder %s133_s24, %s133_s24 }
   0xb   :  { %171 = vmatpush3.msra.mxu0 %v43_v5  ;;  %v34_v14 = vld [vmem:[%s306_s1 + $0x10] sm:$0xff]  ;;  %v33_v15 = vld [vmem:[%s306_s1 + $0x8] sm:$0xff]  ;;  %v32_v16 = vld [vmem:[%s306_s1] sm:$0xff]  ;;  %s200_s1 = scalar_lea.vmem %s133_s24, 256 }
   0xc   :  { %172 = vmatprep.subr.mxu0 %v42_v6  ;;  %v31_v17 = vld [vmem:[%s305_s0 + $0x8] sm:$0xff]  ;;  %v143_v18 = vld [vmem:[%s307_s2] ss:$0 sm:$0xff]  ;;  %p201_p0 = scmp.ne.s32.totalorder %s133_s24, %s200_s1  ;;  %p206_p2 = scmp.lt.s32.totalorder %s200_s1, %s200_s1 }
   0xd   :  { %173 = vmatpush3.msra.mxu0 %v42_v6 }
   0xe   :  { %174 = vmatprep.subr.mxu0 %v41_v7  ;;  %p207_p3 = por %p206_p2, %p205_p1 }
   0xf   :  { %175 = vmatpush3.msra.mxu0 %v41_v7 }
  0x10   :  { %176 = vmatprep.subr.mxu0 %v40_v8  ;;  %p208_p4 = pnand %p207_p3, %p201_p0 }
  0x11   :  { %177 = vmatpush3.msra.mxu0 %v40_v8 }
  0x12   :  { %178 = vmatprep.subr.mxu0 %v39_v9 }
  0x13   :  { %179 = vmatpush3.msra.mxu0 %v39_v9 }
  0x14   :  { %180 = vmatprep.subr.mxu0 %v38_v10 }
  0x15   :  { %181 = vmatpush3.msra.mxu0 %v38_v10 }
  0x16   :  { %182 = vmatprep.subr.mxu0 %v37_v11 }
  0x17   :  { %183 = vmatpush3.msra.mxu0 %v37_v11 }
  0x18   :  { %184 = vmatprep.subr.mxu0 %v36_v12 }
  0x19   :  { %185 = vmatpush3.msra.mxu0 %v36_v12 }
  0x1a   :  { %186 = vmatprep.subr.mxu0 %v35_v13 }
  0x1b   :  { %187 = vmatpush3.msra.mxu0 %v35_v13 }
  0x1c   :  { %188 = vmatprep.subr.mxu0 %v34_v14 }
  0x1d   :  { %189 = vmatpush3.msra.mxu0 %v34_v14 }
  0x1e   :  { %190 = vmatprep.subr.mxu0 %v33_v15 }
  0x1f   :  { %191 = vmatpush3.msra.mxu0 %v33_v15 }
  0x20   :  { %192 = vmatprep.subr.mxu0 %v32_v16 }
  0x21   :  { %193 = vmatpush3.msra.mxu0 %v32_v16 }
  0x22   :  { %195 = vmatmul.mubr.f32.vlgmr.msra.gmra.mxu0 %v31_v17 }
  0xe2   :  { %v196_v19 = vpop.f32.mrf.mxu0 }
  0xe3   :  { %v124_v20 = vadd.f32 %v196_v19, %v143_v18 }
  0xe4   :  { %v114_v21 = vpop.f32.mrf.mxu0 }
  0xe5   :  { %126 = vst [vmem:[#allocation2 + $0x8] sm:$0xff] %v124_v20  ;;  %v123_v22 = vadd.f32 %v143_v18, %v114_v21 }
  0xe7   :  { %125 = vst [vmem:[#allocation2] sm:$0xff] %v123_v22 }
  0xe8   :  { %211 = shalt.err (!%p208_p4)
}
  0xe9   :  { %s223_s0 = smov 128   ;;  %s224_s25 = smov 8  }
  0xea   :  { %138 = dma.vmem_to_hbm [thread:$0]  %s133_s24, 256, %s308_s3, [#allocation3], %s223_s0, %s223_s0, %s224_s25  }
  0xeb   :  { %220 = dma.done.wait [#allocation3], 256  }
  0xec   :  { %221 = vsyncadd [#allocation3], 4294967040 }
  0xed   :  { %142 = vsyncpa [#allocation3], 1 }

</bundles_post_ra>
